<compile_context>
chip_gen: v7x
topology: tpu7x:2x2x1
jax: 0.10.0
libtpu: 0.0.40
codegen_flags: <defaults>
</compile_context>

<pallas_src>
import functools

import jax
import jax.numpy as jnp
from jax.experimental import pallas as pl
from jax.experimental.pallas import tpu as pltpu

_LANE = 128
_SUBLANE = 8


def _round_up(v, m):
    return ((v + m - 1) // m) * m


def _f0_slow_loss_kernel(x_ref, out_ref, carry_ref, *, shift, n_valid, rt, w):
    """One (1, rt, w) tile of a per-batch flat stream.

    Flat position g = (tile_row_offset + row) * w + lane owns the L1 term
    |log(x[g]+1e-3) - log(x[g-shift]+1e-3)|, valid iff shift <= g < n_valid.
    `shift` == C <= w, so the predecessor is in the same row (lane >= s), the
    previous row (lane < s), or the carried last row of the previous tile
    (row == 0, lane < s).
    """
    s = shift % w                    # intra-row part of the shift (0 => whole row)
    j = pl.program_id(1)
    nt = pl.num_programs(1)

    @pl.when(j == 0)
    def _():
        out_ref[...] = jnp.zeros_like(out_ref)
        carry_ref[...] = jnp.zeros_like(carry_ref)

    x = x_ref[...].astype(jnp.float32)               # (1, rt, w), upcast in-kernel
    logx = jnp.log(x + 0.001)

    # y[row, lane] = logx[row, (lane - s) mod w]  (lane rotation, XLU slot).
    y = pltpu.roll(logx, shift=s, axis=2) if s else logx

    prev = carry_ref[...]                            # last row of previous tile's y
    carry_ref[...] = y[:, rt - 1:, :]                # tiny (1, 1, w) carry

    row = jax.lax.broadcasted_iota(jnp.int32, (1, rt, w), 1)
    lane = jax.lax.broadcasted_iota(jnp.int32, (1, rt, w), 2)

    # Previous-row view of y; row 0 is patched from the cross-tile carry.
    from_prev_row = jnp.where(row == 0, prev, pltpu.roll(y, shift=1, axis=1))
    if s:                                            # shift < w
        shifted = jnp.where(lane >= s, y, from_prev_row)
    else:                                            # shift == w: one full row back
        shifted = from_prev_row

    absdiff = jnp.abs(logx - shifted)

    def _accum(vals):
        # Fold rows into one (8, w) slab with pure VPU adds; the cross-lane
        # reduction happens once, in the wrapper.
        out_ref[...] += jnp.sum(
            vals.reshape(rt // _SUBLANE, _SUBLANE, w), axis=0
        ).reshape(1, _SUBLANE, w)

    interior = jnp.logical_and(j > 0, j < nt - 1)

    @pl.when(interior)                               # steady state: mask-free
    def _():
        _accum(absdiff)

    @pl.when(jnp.logical_not(interior))              # first/last tile: mask edges
    def _():
        g = (j * rt + row) * w + lane                # flat index within this batch row
        valid = jnp.logical_and(g >= shift, g < n_valid)
        _accum(jnp.where(valid, absdiff, 0.0))       # select, so garbage/NaN is inert


def f0_slow_loss(f0_predict, *, block_elems=2048 * _LANE):
    """f0_predict: [B, T, C] (f32 or bf16) -> scalar f32 (== F0SlowLoss.forward)."""
    B, T, C = f0_predict.shape
    N = T * C

    if C < _LANE:
        # Lane-dense path: flatten (T, C) into a 128-wide row stream so vregs
        # are fully occupied even for tiny C.  Pad (< 128 elems) to a multiple
        # of 128 only -- never to a multiple of the tile.
        w = _LANE
        rows = pl.cdiv(N, w)
        x = f0_predict.reshape(B, N)
        if N != rows * w:
            # TODO(synk): one extra HBM copy, only when T*C isn't 128-aligned.
            x = jnp.pad(x, ((0, 0), (0, rows * w - N)), constant_values=1.0)
        x = x.reshape(B, rows, w)
    else:
        # C >= 128: rows are already lane-dense and the time shift is exactly
        # one row; no reshape or padding needed.
        w = C
        rows = T
        x = f0_predict

    # Rows per tile: multiple of 8, ~block_elems elements (~1 MiB f32 blocks),
    # clamped so tiny inputs use a single (possibly ragged) block.
    rt = max(_SUBLANE, (block_elems // w) // _SUBLANE * _SUBLANE)
    rt = min(rt, _round_up(rows, _SUBLANE))
    num_tiles = pl.cdiv(rows, rt)

    kernel = functools.partial(_f0_slow_loss_kernel,
                               shift=C, n_valid=N, rt=rt, w=w)

    partial_sums = pl.pallas_call(
        kernel,
        out_shape=jax.ShapeDtypeStruct((B, _SUBLANE, w), jnp.float32),
        grid_spec=pltpu.PrefetchScalarGridSpec(
            num_scalar_prefetch=0,
            grid=(B, num_tiles),
            in_specs=[pl.BlockSpec((1, rt, w), lambda b, j: (b, j, 0))],
            out_specs=pl.BlockSpec((1, _SUBLANE, w), lambda b, j: (b, 0, 0)),
            scratch_shapes=[pltpu.VMEM((1, 1, w), jnp.float32)],
        ),
        compiler_params=pltpu.CompilerParams(
            # batch axis independent -> parallel (megacore); tile axis carries
            # the accumulator + carry -> arbitrary (sequential).
            dimension_semantics=("parallel", "arbitrary"),
        ),
        cost_estimate=pl.CostEstimate(
            flops=6 * B * rows * w,
            transcendentals=B * rows * w,
            bytes_accessed=B * rows * w * x.dtype.itemsize + B * _SUBLANE * w * 4,
        ),
    )(x)

    # TODO(synk): for v7x with B == 1, a second 'parallel' segment axis over the
    # row stream (plus a wrapper fix-up of the C boundary diffs) would keep both
    # TensorCores busy; omitted to keep the carry logic simple.
    denom = B * (T - 1) * C      # 'mean' element count (NaN for T == 1, same as torch)
    return jnp.sum(partial_sums) / denom


if __name__ == "__main__":
    def ref_loss(v):
        lx = jnp.log(v.astype(jnp.float32) + 0.001)
        return jnp.mean(jnp.abs(lx[:, 1:, :] - lx[:, :-1, :]))

    key = jax.random.PRNGKey(0)

    # 1) Baseline small shape [batch, time, channels] consistent with the module.
    x1 = jax.random.uniform(key, (2, 8, 16), jnp.float32, minval=50.0, maxval=400.0)
    out1 = f0_slow_loss(x1)
    jax.block_until_ready(out1)
    assert jnp.allclose(out1, ref_loss(x1), rtol=1e-5, atol=1e-6), (out1, ref_loss(x1))

    # 2) C < 128, multiple tiles: carry, interior fast path, ragged last tile.
    x2 = jax.random.uniform(jax.random.PRNGKey(0), (2, 136, 16), jnp.float32,
                            minval=50.0, maxval=400.0)
    out2 = f0_slow_loss(x2, block_elems=8 * _LANE)
    jax.block_until_ready(out2)
    assert jnp.allclose(out2, ref_loss(x2), rtol=1e-5, atol=1e-6), (out2, ref_loss(x2))

    # 3) T*C not 128-aligned (small pad path) with C < 128.
    x3 = jax.random.uniform(jax.random.PRNGKey(0), (2, 10, 24), jnp.float32,
                            minval=50.0, maxval=400.0)
    out3 = f0_slow_loss(x3)
    jax.block_until_ready(out3)
    assert jnp.allclose(out3, ref_loss(x3), rtol=1e-5, atol=1e-6), (out3, ref_loss(x3))

    # 4) C >= 128 path (pure row shift), ragged T, batch of 1.
    x4 = jax.random.uniform(jax.random.PRNGKey(0), (1, 19, 200), jnp.float32,
                            minval=50.0, maxval=400.0)
    out4 = f0_slow_loss(x4, block_elems=8 * 200)
    jax.block_until_ready(out4)
    assert jnp.allclose(out4, ref_loss(x4), rtol=1e-5, atol=1e-6), (out4, ref_loss(x4))

    print("KERNEL_OK")
</pallas_src>

<mosaic_0001>
module attributes {stable_mosaic.version = 11 : i64} {
  func.func @_f0_slow_loss_kernel(%arg0: i32, %arg1: i32, %arg2: memref<1x8x128xf32, #tpu.memory_space<vmem>>, %arg3: memref<1x8x128xf32, #tpu.memory_space<vmem>>, %arg4: memref<1x1x128xf32, #tpu.memory_space<vmem>>) attributes {dimension_semantics = [#tpu.dimension_semantics<parallel>, #tpu.dimension_semantics<arbitrary>], iteration_bounds = array<i64: 2, 1>, scalar_prefetch = 0 : i64, scratch_operands = 1 : i64, tpu.core_type = #tpu.core_type<tc>, window_params = [{transform_indices = @transform_0, window_bounds = array<i64: 1, 8, 128>}, {transform_indices = @transform_1, window_bounds = array<i64: 1, 8, 128>}]} {
    %c0_i32 = arith.constant 0 : i32
    %0 = arith.cmpi eq, %arg1, %c0_i32 : i32
    %1 = arith.extui %0 : i1 to i32
    %c0_i32_0 = arith.constant 0 : i32
    %2 = arith.cmpi ne, %1, %c0_i32_0 : i32
    scf.if %2 {
      %cst_15 = arith.constant 0.000000e+00 : f32
      %32 = vector.broadcast %cst_15 : f32 to vector<1x8x128xf32>
      %c0_16 = arith.constant 0 : index
      %c0_17 = arith.constant 0 : index
      %c0_18 = arith.constant 0 : index
      %33 = vector.load %arg3[%c0_16, %c0_17, %c0_18] : memref<1x8x128xf32, #tpu.memory_space<vmem>>, vector<1x8x128xf32>
      tpu.vector_store %arg3[%c0_16, %c0_17, %c0_18], %32 {strides = array<i32>} : memref<1x8x128xf32, #tpu.memory_space<vmem>>, vector<1x8x128xf32>,
      %cst_19 = arith.constant 0.000000e+00 : f32
      %34 = vector.broadcast %cst_19 : f32 to vector<1x1x128xf32>
      %c0_20 = arith.constant 0 : index
      %c0_21 = arith.constant 0 : index
      %c0_22 = arith.constant 0 : index
      %35 = vector.load %arg4[%c0_20, %c0_21, %c0_22] : memref<1x1x128xf32, #tpu.memory_space<vmem>>, vector<1x1x128xf32>
      tpu.vector_store %arg4[%c0_20, %c0_21, %c0_22], %34 {strides = array<i32>} : memref<1x1x128xf32, #tpu.memory_space<vmem>>, vector<1x1x128xf32>,
    } else {
    }
    %c0 = arith.constant 0 : index
    %c0_1 = arith.constant 0 : index
    %c0_2 = arith.constant 0 : index
    %3 = vector.load %arg2[%c0, %c0_1, %c0_2] : memref<1x8x128xf32, #tpu.memory_space<vmem>>, vector<1x8x128xf32>
    %cst = arith.constant 1.000000e-03 : f32
    %4 = vector.broadcast %cst : f32 to vector<1x8x128xf32>
    %5 = arith.addf %3, %4 : vector<1x8x128xf32>
    %6 = math.log %5 : vector<1x8x128xf32>
    %c16_i32 = arith.constant 16 : i32
    %7 = tpu.dynamic_rotate %6 by %c16_i32 dim 2 : vector<1x8x128xf32>, i32 -> vector<1x8x128xf32>
    %c0_3 = arith.constant 0 : index
    %c0_4 = arith.constant 0 : index
    %c0_5 = arith.constant 0 : index
    %8 = vector.load %arg4[%c0_3, %c0_4, %c0_5] : memref<1x1x128xf32, #tpu.memory_space<vmem>>, vector<1x1x128xf32>
    %9 = vector.extract_strided_slice %7 {offsets = [0, 7, 0], sizes = [1, 1, 128], strides = [1, 1, 1]} : vector<1x8x128xf32> to vector<1x1x128xf32>
    %c0_6 = arith.constant 0 : index
    %c0_7 = arith.constant 0 : index
    %c0_8 = arith.constant 0 : index
    %10 = vector.load %arg4[%c0_6, %c0_7, %c0_8] : memref<1x1x128xf32, #tpu.memory_space<vmem>>, vector<1x1x128xf32>
    tpu.vector_store %arg4[%c0_6, %c0_7, %c0_8], %9 {strides = array<i32>} : memref<1x1x128xf32, #tpu.memory_space<vmem>>, vector<1x1x128xf32>,
    %11 = tpu.iota {dimensions = array<i32: 1>} : vector<1x8x128xi32>
    %12 = tpu.iota {dimensions = array<i32: 2>} : vector<1x8x128xi32>
    %c0_i32_9 = arith.constant 0 : i32
    %13 = vector.broadcast %c0_i32_9 : i32 to vector<1x8x128xi32>
    %14 = arith.cmpi eq, %11, %13 : vector<1x8x128xi32>
    %c1_i32 = arith.constant 1 : i32
    %15 = tpu.dynamic_rotate %7 by %c1_i32 dim 1 : vector<1x8x128xf32>, i32 -> vector<1x8x128xf32>
    %16 = vector.shape_cast %8 : vector<1x1x128xf32> to vector<1x1x128xf32>
    %17 = vector.broadcast %16 : vector<1x1x128xf32> to vector<1x8x128xf32>
    %18 = arith.select %14, %17, %15 : vector<1x8x128xi1>, vector<1x8x128xf32>
    %c16_i32_10 = arith.constant 16 : i32
    %19 = vector.broadcast %c16_i32_10 : i32 to vector<1x8x128xi32>
    %20 = arith.cmpi sge, %12, %19 : vector<1x8x128xi32>
    %21 = arith.select %20, %7, %18 : vector<1x8x128xi1>, vector<1x8x128xf32>
    %22 = arith.subf %6, %21 : vector<1x8x128xf32>
    %23 = math.absf %22 : vector<1x8x128xf32>
    %c0_i32_11 = arith.constant 0 : i32
    %24 = arith.cmpi sgt, %arg1, %c0_i32_11 : i32
    %c0_i32_12 = arith.constant 0 : i32
    %25 = arith.cmpi slt, %arg1, %c0_i32_12 : i32
    %26 = arith.andi %24, %25 : i1
    %27 = arith.extui %26 : i1 to i32
    %c0_i32_13 = arith.constant 0 : i32
    %28 = arith.cmpi ne, %27, %c0_i32_13 : i32
    scf.if %28 {
      %c0_15 = arith.constant 0 : index
      %c0_16 = arith.constant 0 : index
      %c0_17 = arith.constant 0 : index
      %32 = vector.load %arg3[%c0_15, %c0_16, %c0_17] : memref<1x8x128xf32, #tpu.memory_space<vmem>>, vector<1x8x128xf32>
      %cst_18 = arith.constant dense<0.000000e+00> : vector<8x128xf32>
      %33 = vector.multi_reduction <add>, %23, %cst_18 [0] : vector<1x8x128xf32> to vector<8x128xf32>
      %34 = vector.shape_cast %33 : vector<8x128xf32> to vector<1x8x128xf32>
      %35 = arith.addf %32, %34 : vector<1x8x128xf32>
      %c0_19 = arith.constant 0 : index
      %c0_20 = arith.constant 0 : index
      %c0_21 = arith.constant 0 : index
      %36 = vector.load %arg3[%c0_19, %c0_20, %c0_21] : memref<1x8x128xf32, #tpu.memory_space<vmem>>, vector<1x8x128xf32>
      tpu.vector_store %arg3[%c0_19, %c0_20, %c0_21], %35 {strides = array<i32>} : memref<1x8x128xf32, #tpu.memory_space<vmem>>, vector<1x8x128xf32>,
    } else {
    }
    %true = arith.constant true
    %29 = arith.xori %26, %true : i1
    %30 = arith.extui %29 : i1 to i32
    %c0_i32_14 = arith.constant 0 : i32
    %31 = arith.cmpi ne, %30, %c0_i32_14 : i32
    scf.if %31 {
      %c8_i32 = arith.constant 8 : i32
      %32 = arith.muli %arg1, %c8_i32 : i32
      %33 = vector.broadcast %32 : i32 to vector<1x8x128xi32>
      %34 = arith.addi %33, %11 : vector<1x8x128xi32>
      %c128_i32 = arith.constant 128 : i32
      %35 = vector.broadcast %c128_i32 : i32 to vector<1x8x128xi32>
      %36 = arith.muli %34, %35 : vector<1x8x128xi32>
      %37 = arith.addi %36, %12 : vector<1x8x128xi32>
      %c16_i32_15 = arith.constant 16 : i32
      %38 = vector.broadcast %c16_i32_15 : i32 to vector<1x8x128xi32>
      %39 = arith.cmpi sge, %37, %38 : vector<1x8x128xi32>
      %c128_i32_16 = arith.constant 128 : i32
      %40 = vector.broadcast %c128_i32_16 : i32 to vector<1x8x128xi32>
      %41 = arith.cmpi slt, %37, %40 : vector<1x8x128xi32>
      %42 = arith.andi %39, %41 : vector<1x8x128xi1>
      %cst_17 = arith.constant 0.000000e+00 : f32
      %43 = vector.broadcast %cst_17 : f32 to vector<1x8x128xf32>
      %44 = arith.select %42, %23, %43 : vector<1x8x128xi1>, vector<1x8x128xf32>
      %c0_18 = arith.constant 0 : index
      %c0_19 = arith.constant 0 : index
      %c0_20 = arith.constant 0 : index
      %45 = vector.load %arg3[%c0_18, %c0_19, %c0_20] : memref<1x8x128xf32, #tpu.memory_space<vmem>>, vector<1x8x128xf32>
      %cst_21 = arith.constant dense<0.000000e+00> : vector<8x128xf32>
      %46 = vector.multi_reduction <add>, %44, %cst_21 [0] : vector<1x8x128xf32> to vector<8x128xf32>
      %47 = vector.shape_cast %46 : vector<8x128xf32> to vector<1x8x128xf32>
      %48 = arith.addf %45, %47 : vector<1x8x128xf32>
      %c0_22 = arith.constant 0 : index
      %c0_23 = arith.constant 0 : index
      %c0_24 = arith.constant 0 : index
      %49 = vector.load %arg3[%c0_22, %c0_23, %c0_24] : memref<1x8x128xf32, #tpu.memory_space<vmem>>, vector<1x8x128xf32>
      tpu.vector_store %arg3[%c0_22, %c0_23, %c0_24], %48 {strides = array<i32>} : memref<1x8x128xf32, #tpu.memory_space<vmem>>, vector<1x8x128xf32>,
    } else {
    }
    return
  }
  func.func @transform_0(%arg0: i32, %arg1: i32) -> (i32, i32, i32) {
    %c0_i32 = arith.constant 0 : i32
    %c0_i32_0 = arith.constant 0 : i32
    return %arg0, %arg1, %c0_i32 : i32, i32, i32
  }
  func.func @transform_1(%arg0: i32, %arg1: i32) -> (i32, i32, i32) {
    %c0_i32 = arith.constant 0 : i32
    %c0_i32_0 = arith.constant 0 : i32
    %c0_i32_1 = arith.constant 0 : i32
    return %arg0, %c0_i32, %c0_i32_0 : i32, i32, i32
  }
}

</mosaic_0001>

<bundles_post_ra>
// kernel: tpu_custom_call.1
= control target key start
LH: loop header
LB: loop body
LE: loop exit
PB: predicated region body
PF: predicated region fallthrough
CT: control target
= control target key end

     0   :  { %6 = vsyncpa [#allocation4], 0  ;;  %s658_s0 = inlined_call_operand.hbm [shape: f32[2,1,128], index: 0, kind: input, shape index: {}]   ;;  %s659_s1 = inlined_call_operand.hbm [shape: f32[2,8,128], index: 1, kind: output, shape index: {}]  }
   0x1   :  { %8 = vsyncpa [#allocation4 + $0x1], 0 }
   0x2   :  { %9 = vsyncpa [#allocation5], 0 }
   0x3   :  { %11 = vsyncpa [#allocation5 + $0x1], 0  ;;  %s507_s6 = smov 0   ;;  %s509_s7 = smov 0  }
   0x4   :  { %s511_s8 = smov 0   ;;  %s513_s9 = smov 0  }
   0x5   :  { %s515_s10 = smov 0   ;;  %s517_s11 = smov 0  }
   0x6 LB: > { %s307_s12 = sadd.s32 4294967295, %s489_s11   ;;  %s308_s13 = sadd.s32 4294967294, %s489_s11   ;;  %s489_s11 = sphi %s517_s11, %s17_s11   ;;  %s485_s10 = sphi %s515_s10, %s670_s10   ;;  %s481_s9 = sphi %s513_s9, %s669_s9   ;;  %s477_s8 = sphi %s511_s8, %s668_s8   ;;  %s473_s7 = sphi %s509_s7, %s667_s7   ;;  %s469_s6 = sphi %s507_s6, %s666_s6  }
   0x7   : > { %s29_s14 = sadd.s32 1, %s485_s10  ;;  %s38_s15 = sadd.s32 1, %s477_s8 }
   0x8   : > { %p31_p0 = scmp.ge.s32.totalorder %s29_s14, 2  ;;  %p45_p1 = scmp.ne.s32.totalorder %s477_s8, %s473_s7 }
   0x9   : > { %p46_p2 = scmp.eq.s32.totalorder %s489_s11, 0  ;;  %p51_p3 = scmp.ne.s32.totalorder %s473_s7, %s469_s6 }
   0xa   : > { %s672_s14 = smov (%p31_p0, %s29_s14), 0  ;;  %p52_p5 = scmp.eq.s32.totalorder %s307_s12, 0 }
   0xb   : > { %p47_p4 = por %p46_p2, %p45_p1  ;;  %s33_s16 = ssub.s32 %s485_s10, %s672_s14 }
   0xc   : > { %p75_p6 = scmp.eq.s32.totalorder %s307_s12, 1  ;;  %p36_p7 = scmp.eq.s32.totalorder %s33_s16, 0 }
   0xd   : > { %p550_p8 = por %p52_p5, %p51_p3  ;;  %p81_p10 = scmp.eq.s32.totalorder %s308_s13, 1 }
   0xe   : > { %p554_p9 = por %p75_p6, %p45_p1  ;;  %p660_p12 = scmp.ge.s32.totalorder %s489_s11, 2 }
   0xf   : > { %s559_s19 = scalar_select %p36_p7, %s477_s8, %s38_s15  }
  0x10   : > { %p561_p11 = por %p81_p10, %p51_p3  ;;  %97 = sbr.rel (%p660_p12) target bundleno = 54 (0x36), region = 16 }
  0x12   : > { %s663_s20 = scalar_select %p561_p11, 1, 0 }
  0x17   : > { %100 = sbr.rel (!%p47_p4) target bundleno = 54 (0x36), region = 20  ;;  %s101_s21 = sand.u32 (%p47_p4), 1, %s477_s8  }
  0x18   : > { %s311_s22 = sshll.u32 (%p47_p4), %s101_s21, 3  ;;  %s569_s23 = scalar_lea.sflag (%p47_p4), [#allocation4], %s101_s21 }
  0x19   : > { %s105_s24 = scalar_lea.vmem (%p47_p4), [#allocation3], %s311_s22 }
  0x1e   : > { %111 = vsyncadd %s569_s23, 112  ;;  %s312_s25 = sshll.u32 %s485_s10, 4  ;;  %s116_s26 = sshll.u32 %s105_s24, 4  ;;  %s117_s26 = int_to_ptr.vmem [resolvable:$true] %s116_s26 }
  0x1f   : > { %s576_s29 = scalar_lea.hbm %s658_s0, %s312_s25  ;;  %s385_s4 = scalar_lea.hbm %s658_s0, 32 }
  0x20   : > { %s383_s30 = scalar_lea.hbm %s576_s29, 16  ;;  %p386_p0 = scmp.lt.u32.totalorder %s576_s29, %s658_s0 }
  0x21   : > { %p384_p13 = scmp.ne.s32.totalorder %s576_s29, %s383_s30  ;;  %p387_p1 = scmp.lt.u32.totalorder %s385_s4, %s383_s30 }
  0x22   : > { %p389_p3 = scmp.lt.u32.totalorder %s383_s30, %s576_s29 }
  0x23   : > { %p388_p2 = por %p387_p1, %p386_p0 }
  0x25   : > { %p390_p4 = por %p389_p3, %p388_p2 }
  0x27   : > { %p391_p5 = pnand %p390_p4, %p384_p13 }
  0x29   : > { %394 = shalt.err (!%p391_p5)
}
  0x2a   : > { %s395_s13 = scalar_lea.vmem %s117_s26, 16  ;;  %s491_s15 = smov [#allocation3]  }
  0x2b   : > { %p396_p6 = scmp.ne.s32.totalorder %s117_s26, %s395_s13  ;;  %s397_s16 = sshll.u32 %s491_s15, 4  ;;  %s398_s16 = int_to_ptr.vmem [resolvable:$false] %s397_s16 }
  0x2c   : > { %s399_s21 = scalar_lea.vmem %s398_s16, 256  ;;  %p400_p7 = scmp.lt.s32.totalorder %s117_s26, %s398_s16 }
  0x2d   : > { %p401_p10 = scmp.lt.s32.totalorder %s399_s21, %s395_s13 }
  0x2f   : > { %p402_p12 = por %p401_p10, %p400_p7 }
  0x31   : > { %p403_p11 = pnand %p402_p12, %p396_p6 }
  0x33   : > { %406 = shalt.err (!%p403_p11)
}
  0x34   : > { %s492_s22 = smov 16   ;;  %s493_s24 = smov 1  }
  0x35   : > { %122 = dma.hbm_to_vmem [thread:$0]  %s576_s29, 16, %s117_s26, %s569_s23, %s492_s22, %s492_s22, %s493_s24  }
  0x36 PF: > { %p313_p13 = scmp.ge.s32.totalorder %s489_s11, 1  ;;  %p124_p0 = scmp.lt.s32.totalorder %s489_s11, 3 }
  0x38   : > { %p125_p1 = pnand %p313_p13, %p124_p0 }
  0x39   : > { %s593_s25 = sand.u32 (!%p125_p1), 1, %s473_s7  }
  0x3a   : > { %128 = sbr.rel (%p125_p1) target bundleno = 220 (0xdc), region = 24  ;;  %s314_s27 = sshll.u32 (!%p125_p1), %s593_s25, 3 }
  0x3b   : > { %s131_s28 = scalar_lea.sflag (!%p125_p1), [#allocation4], %s593_s25  ;;  %s134_s30 = scalar_lea.vmem (!%p125_p1), [#allocation3], %s314_s27 }
  0x41   : > { %460 = dma.done.wait (%p550_p8), %s131_s28, 128  }
  0x42   : > { %462 = vsyncadd (%p550_p8), %s131_s28, 4294967168  ;;  %v494_v0 = vmov 0.0   ;;  %v162_v1 = vld [vmem:[%s134_s30] sm:$0xff]  ;;  %s495_s23 = smov 16   ;;  %v170_v5 = vlaneseq  ;;  %s318_s17 = sshll.u32 %s481_s9, 7 }
  0x43   : > { %161 = vst [vmem:[#allocation2] sm:$0x1] %v494_v0  ;;  %v163_v2 = vadd.f32 0.001, %v162_v1  ;;  %s152_s26 = scalar_lea.vmem [#allocation6], %s314_s27  ;;  %s609_s4 = scalar_lea.hbm %s659_s1, %s318_s17 }
  0x44   : > { %v171_v6 = vshrl.u32 %v170_v5, 7  ;;  %v173_v8 = vand.u32 127, %v170_v5  ;;  %s227_s29 = sshll.u32 %s152_s26, 4  ;;  %s214_s5 = scalar_lea.sflag [#allocation5], %s593_s25  ;;  %s611_s29 = int_to_ptr.vmem [resolvable:$true] %s227_s29 }
  0x45   : > { %381 = vlog2.f32 %v163_v2  ;;  %s407_s12 = scalar_lea.vmem %s611_s29, 128  ;;  %s496_s9 = smov [#allocation6]  }
  0x46   : > { %v203_v7 = vmul.u32 128, %v171_v6  ;;  %vm174_vm0 = vcmp.eq.s32.totalorder %v171_v6, 0  ;;  %vm183_vm1 = vcmp.ge.s32.totalorder %v173_v8, 16  ;;  %p408_p8 = scmp.ne.s32.totalorder %s611_s29, %s407_s12  ;;  %s411_s13 = sshll.u32 %s496_s9, 4  ;;  %s412_s13 = int_to_ptr.vmem [resolvable:$false] %s411_s13 }
  0x47   : > { %s413_s15 = scalar_lea.vmem %s412_s13, 256  ;;  %p414_p2 = scmp.lt.s32.totalorder %s611_s29, %s412_s13 }
  0x48   : > { %v204_v10 = vadd.s32 %v203_v7, %v173_v8  ;;  %p409_p11 = pnand %p408_p8, %p554_p9  ;;  %p415_p3 = scmp.lt.s32.totalorder %s413_s15, %s407_s12 }
  0x4a   : > { %v316_v9 = vld [vmem:[#allocation2] ss:$0 sm:$0xff]  ;;  %vm205_vm2 = vcmp.ge.s32.totalorder %v204_v10, 16  ;;  %vm206_vm3 = vcmp.lt.s32.totalorder %v204_v10, 128  ;;  %p410_p12 = pneg %p409_p11  ;;  %p416_p4 = por %p415_p3, %p414_p2 }
  0x4b   : > { %vm207_vm4 = vmand %vm205_vm2, %vm206_vm3 }
  0x4c   : > { %p417_p5 = pnand %p416_p4, %p410_p12 }
  0x4f   : > { %v382_v3 = vpop.eup %381 }
  0x50   : > { %v165_v4 = vmul.f32 0.6931472, %v382_v3 }
  0x52   : > { %166 = vrot.lane.b32.xlu0 %v165_v4, %s495_s23 }
  0xc4   : > { %v167_v11 = vpop.permute.xlu0 %166 }
  0xc5   : > { %169 = vst [vmem:[#allocation2 - $0x7] sm:$0x80] %v167_v11  ;;  %v175_v12 = vrot.slane %v167_v11, 7 }
  0xc7   : > { %v182_v13 = vsel %vm174_vm0, %v316_v9, %v175_v12 }
  0xc8   : > { %v184_v14 = vsel %vm183_vm1, %v167_v11, %v182_v13 }
  0xc9   : > { %v185_v15 = vsub.f32 %v165_v4, %v184_v14 }
  0xcb   : > { %v186_v16 = vand.u32 2147483647, %v185_v15 }
  0xcd   : > { %v208_v17 = vsel %vm207_vm4, %v186_v16, 0.0 }
  0xce   : > { %212 = vst [vmem:[%s152_s26] sm:$0xff] %v208_v17 }
  0xcf   : > { %420 = shalt.err (!%p417_p5)
}
  0xd0   : > { %s421_s16 = scalar_lea.hbm %s609_s4, 128  ;;  %s425_s24 = scalar_lea.hbm %s659_s1, 256 }
  0xd1   : > { %p422_p6 = scmp.ne.s32.totalorder %s609_s4, %s421_s16  ;;  %p426_p13 = scmp.lt.u32.totalorder %s609_s4, %s659_s1 }
  0xd2   : > { %p427_p0 = scmp.lt.u32.totalorder %s425_s24, %s421_s16  ;;  %p429_p8 = scmp.lt.u32.totalorder %s421_s16, %s609_s4 }
  0xd3   : > { %p423_p7 = pnand %p422_p6, %p554_p9 }
  0xd4   : > { %p428_p1 = por %p427_p0, %p426_p13 }
  0xd5   : > { %p424_p10 = pneg %p423_p7 }
  0xd6   : > { %p430_p11 = por %p429_p8, %p428_p1 }
  0xd8   : > { %p431_p12 = pnand %p430_p11, %p424_p10 }
  0xda   : > { %434 = shalt.err (!%p431_p12)
}
  0xdb   : > { %322 = dma.vmem_to_hbm [thread:$0]  (%p554_p9), %s611_s29, 128, %s609_s4, %s214_s5  }
  0xdc PF: > { %s239_s28 = sand.u32 1, %s469_s6   ;;  %p664_p2 = scmp.ne.s32.totalorder %s663_s20, 0 }
  0xdd   : > { %p665_p3 = scmp.ge.s32.totalorder %s489_s11, 2  ;;  %s240_s30 = scalar_lea.sflag [#allocation5], %s239_s28 }
  0xdf   : > { %p325_p4 = pnand %p665_p3, %p664_p2 }
  0xe1   : > { %464 = dma.done.wait (!%p325_p4), %s240_s30, 128  }
  0xe2   : > { %466 = vsyncadd (!%p325_p4), %s240_s30, 4294967168  ;;  %s17_s11 = sadd.s32 1, %s489_s11   ;;  %s666_s6 = smov %s473_s7 }
  0xe3   : > { %p14_p5 = scmp.ge.s32.totalorder %s17_s11, 4   ;;  %s667_s7 = smov %s477_s8 }
  0xe4   : > { %s668_s8 = smov %s559_s19  ;;  %s669_s9 = smov %s485_s10 }
  0xe5   : > { %s670_s10 = smov %s672_s14  ;;  %16 = sbr.rel (!%p14_p5) target bundleno = 6 (0x6), region = 81 }
  0xec   :  { %245 = vsyncpa [#allocation4], 1 }
  0xed   :  { %247 = vsyncpa [#allocation4 + $0x1], 1 }
  0xee   :  { %248 = vsyncpa [#allocation5], 1 }
  0xef   :  { %250 = vsyncpa [#allocation5 + $0x1], 1 }

</bundles_post_ra>
